<compile_context>
chip_gen: v7x
topology: tpu7x:2x2x1
jax: 0.10.0
libtpu: 0.0.40
codegen_flags: <defaults>
</compile_context>

<pallas_src>
import jax
import jax.numpy as jnp
from jax import lax
from jax.experimental import pallas as pl
from jax.experimental.pallas import tpu as pltpu


# ----------------------------------------------------------------------------
# Pass 1: 3x3 conv (+ bias) as one fat, lane-dense MXU matmul per (n, h-tile),
#         fused with per-tile BatchNorm partial statistics.
# ----------------------------------------------------------------------------
def _make_conv_kernel(tile_h):
    def kernel(xt_ref, wb_ref, brow_ref, y_ref, stat_ref):
        # xt_ref  : (1, 1, tile_h+2, (W+2)*Cin)  lane-folded input tile (+1 row halo)
        # wb_ref  : (3*(W+2)*Cin, W*Cout)        banded weight matrix
        # brow_ref: (1, W*Cout)                  per-channel bias tiled across W
        # y_ref   : (1, tile_h, W*Cout)          lane-dense conv output slab
        # stat_ref: (1, 1, 2, W*Cout)            per-tile [sum ; sum-of-squares]
        xf = xt_ref[0, 0]                                          # (tile_h+2, (W+2)*Cin)

        # Three row-shifted slabs side-by-side on the lane axis -> K = 3*(W+2)*Cin.
        lhs = jnp.concatenate(
            [xf[kh:kh + tile_h, :] for kh in range(3)], axis=1)    # (tile_h, 3*(W+2)*Cin)

        acc = jnp.dot(lhs, wb_ref[...],
                      preferred_element_type=jnp.float32)          # (tile_h, W*Cout)
        acc = acc + brow_ref[...]                                  # bias (broadcast)

        y_ref[0] = acc                                             # lane-dense store

        # BatchNorm partial statistics (per-channel fold-up happens outside on
        # a tiny (2, Cout) tensor).
        s = jnp.sum(acc, axis=0, keepdims=True)                    # (1, W*Cout)
        ss = jnp.sum(acc * acc, axis=0, keepdims=True)             # (1, W*Cout)
        stat_ref[0, 0] = jnp.concatenate([s, ss], axis=0)          # (2, W*Cout)

    return kernel


# ----------------------------------------------------------------------------
# Pass 2: BatchNorm affine apply + LeakyReLU(0.01), tiled and lane-dense.
# ----------------------------------------------------------------------------
def _bn_lrelu_kernel(y_ref, scale_ref, shift_ref, o_ref):
    # y_ref / o_ref : (1, tile_h, W*Cout)
    # scale / shift : (1, W*Cout)   (per-channel values already tiled across W)
    y = y_ref[0]
    out = y * scale_ref[...] + shift_ref[...]
    o_ref[0] = jnp.where(out >= 0, out, 0.01 * out)                # LeakyReLU


# ----------------------------------------------------------------------------
# Helpers.
# ----------------------------------------------------------------------------
def _choose_tile_h(H, W, Cin, Cout):
    """H tile: multiple of 8 (sublanes), divides H, small VMEM working set, and
    >= 2 tiles when possible so v7x's two TensorCores both get parallel work."""
    divs = [d for d in range(8, H + 1, 8) if H % d == 0]
    if not divs:
        return H                                   # tiny H: single full-height tile
    bytes_per_row = 4 * (2 * (W + 2) * Cin + 2 * W * Cout)   # in+out, double buffered
    budget = 2 << 20                               # ~2 MiB per-step working set
    fitting = [d for d in divs if d * bytes_per_row <= budget] or [divs[0]]
    t = max(fitting)
    if H // t < 2:
        smaller = [d for d in divs if H // d >= 2]
        if smaller:
            t = max(smaller)
    return t


def _banded_weight(w_hwio, W, Cin, Cout):
    """Banded RHS:  B[kh*(W+2)*Cin + (w+kw)*Cin + ci, w*Cout + co] =
    w_hwio[kh, kw, ci, co], zeros elsewhere.  Tiny; built once per call."""
    p = jnp.arange(W + 2)[None, :, None]           # padded input column
    w = jnp.arange(W)[None, None, :]               # output column
    kw = jnp.arange(3)[:, None, None]
    masks = (p - w == kw).astype(w_hwio.dtype)     # (3, W+2, W)
    b5 = jnp.einsum("kpw,hkio->hpiwo", masks, w_hwio)  # (3, W+2, Cin, W, Cout)
    return b5.reshape(3 * (W + 2) * Cin, W * Cout)


# ----------------------------------------------------------------------------
# Wrapper: NCHW in -> NCHW out (PyTorch convention); lane-folded layout inside.
# ----------------------------------------------------------------------------
def conv_bn_lrelu(x_nchw, weight, bias, gamma, beta, eps=1e-5):
    # x_nchw : (N, Cin, H, W) f32; weight: (Cout, Cin, 3, 3); bias/gamma/beta: (Cout,)
    N, Cin, H, W = x_nchw.shape
    Cout = weight.shape[0]
    tile_h = _choose_tile_h(H, W, Cin, Cout)
    n_ht = H // tile_h
    WC = W * Cout
    WPC = (W + 2) * Cin

    # ---- wrapper-side layout prep (cheap at these sizes) --------------------
    x_nhwc = jnp.transpose(x_nchw, (0, 2, 3, 1))
    x_pad = jnp.pad(x_nhwc, ((0, 0), (1, 1), (1, 1), (0, 0)))      # 1-pixel zero halo
    x_fold = x_pad.reshape(N, H + 2, WPC)                          # channels -> lanes
    # Overlapping (+2-row halo) H tiles.  Production: replace with element-offset
    # index maps / manual DMA so no duplicated rows ever hit HBM.
    x_tiles = jnp.stack(
        [lax.dynamic_slice_in_dim(x_fold, i * tile_h, tile_h + 2, axis=1)
         for i in range(n_ht)], axis=1)                            # (N, n_ht, tile_h+2, WPC)

    w_hwio = jnp.transpose(weight, (2, 3, 1, 0)).astype(jnp.float32)  # (3,3,Cin,Cout)
    wb = _banded_weight(w_hwio, W, Cin, Cout)                      # (3*WPC, WC)
    bias_row = jnp.tile(bias.astype(jnp.float32), W).reshape(1, WC)

    cparams = pltpu.CompilerParams(
        dimension_semantics=("parallel", "parallel"),
        vmem_limit_bytes=48 * 1024 * 1024,      # fits v7x's 64 MiB VMEM with headroom
    )

    conv_y, stats = pl.pallas_call(
        _make_conv_kernel(tile_h),
        out_shape=(
            jax.ShapeDtypeStruct((N, H, WC), jnp.float32),
            jax.ShapeDtypeStruct((N, n_ht, 2, WC), jnp.float32),
        ),
        grid_spec=pltpu.PrefetchScalarGridSpec(
            num_scalar_prefetch=0,
            grid=(N, n_ht),
            in_specs=[
                pl.BlockSpec((1, 1, tile_h + 2, WPC), lambda n, i: (n, i, 0, 0)),
                pl.BlockSpec((3 * WPC, WC), lambda n, i: (0, 0)),
                pl.BlockSpec((1, WC), lambda n, i: (0, 0)),
            ],
            out_specs=[
                pl.BlockSpec((1, tile_h, WC), lambda n, i: (n, i, 0)),
                pl.BlockSpec((1, 1, 2, WC), lambda n, i: (n, i, 0, 0)),
            ],
        ),
        compiler_params=cparams,
    )(x_tiles, wb, bias_row)

    # ---- finalize BatchNorm statistics on a tiny (2, Cout) tensor -----------
    st = stats.reshape(N, n_ht, 2, W, Cout).sum(axis=(0, 1, 3))    # (2, Cout)
    cnt = jnp.float32(N * H * W)
    mean = st[0] / cnt
    var = jnp.maximum(st[1] / cnt - mean * mean, 0.0)              # biased variance
    scale = gamma.astype(jnp.float32) * lax.rsqrt(var + eps)
    shift = beta.astype(jnp.float32) - mean * scale
    scale_row = jnp.tile(scale, W).reshape(1, WC)
    shift_row = jnp.tile(shift, W).reshape(1, WC)

    out_fold = pl.pallas_call(
        _bn_lrelu_kernel,
        out_shape=jax.ShapeDtypeStruct((N, H, WC), jnp.float32),
        grid_spec=pltpu.PrefetchScalarGridSpec(
            num_scalar_prefetch=0,
            grid=(N, n_ht),
            in_specs=[
                pl.BlockSpec((1, tile_h, WC), lambda n, i: (n, i, 0)),
                pl.BlockSpec((1, WC), lambda n, i: (0, 0)),
                pl.BlockSpec((1, WC), lambda n, i: (0, 0)),
            ],
            out_specs=pl.BlockSpec((1, tile_h, WC), lambda n, i: (n, i, 0)),
        ),
        compiler_params=cparams,
    )(conv_y, scale_row, shift_row)

    out_nhwc = out_fold.reshape(N, H, W, Cout)      # free un-fold (row-major)
    return jnp.transpose(out_nhwc, (0, 3, 1, 2))    # back to NCHW


# ----------------------------------------------------------------------------
# Pure-JAX reference (correctness check only).
# ----------------------------------------------------------------------------
def reference(x_nchw, weight, bias, gamma, beta):
    conv = lax.conv_general_dilated(
        x_nchw, weight, window_strides=(1, 1), padding=((1, 1), (1, 1)),
        dimension_numbers=("NCHW", "OIHW", "NCHW"),
    ) + bias[None, :, None, None]
    mean = jnp.mean(conv, axis=(0, 2, 3), keepdims=True)
    var = jnp.mean((conv - mean) ** 2, axis=(0, 2, 3), keepdims=True)
    xhat = (conv - mean) * lax.rsqrt(var + 1e-5)
    out = xhat * gamma[None, :, None, None] + beta[None, :, None, None]
    return jnp.where(out >= 0, out, 0.01 * out)


if __name__ == "__main__":
    key = jax.random.PRNGKey(0)
    k_x, k_w, k_b = jax.random.split(key, 3)

    N, Cin, Cout, H, W = 2, 4, 8, 16, 16
    x = jax.random.normal(k_x, (N, Cin, H, W), jnp.float32)

    # Deterministic parameter init (shapes match nn.Conv2d / nn.BatchNorm2d).
    fan_in = Cin * 3 * 3
    wscale = 1.0 / jnp.sqrt(jnp.float32(fan_in))
    weight = jax.random.uniform(k_w, (Cout, Cin, 3, 3), jnp.float32,
                                minval=-wscale, maxval=wscale)
    bias = jax.random.uniform(k_b, (Cout,), jnp.float32,
                              minval=-wscale, maxval=wscale)
    gamma = jnp.ones((Cout,), jnp.float32)   # BatchNorm weight init
    beta = jnp.zeros((Cout,), jnp.float32)   # BatchNorm bias init

    fn = jax.jit(conv_bn_lrelu)
    out = jax.block_until_ready(fn(x, weight, bias, gamma, beta))
    ref = jax.block_until_ready(reference(x, weight, bias, gamma, beta))

    assert out.shape == (N, Cout, H, W)
    err = float(jnp.max(jnp.abs(out - ref)))
    assert jnp.allclose(out, ref, rtol=1e-4, atol=1e-4), err
    print("KERNEL_OK")
</pallas_src>

<mosaic_0001>
module attributes {stable_mosaic.version = 11 : i64} {
  func.func @kernel(%arg0: i32, %arg1: i32, %arg2: memref<1x1x10x72xf32, #tpu.memory_space<vmem>>, %arg3: memref<216x128xf32, #tpu.memory_space<vmem>>, %arg4: memref<1x128xf32, #tpu.memory_space<vmem>>, %arg5: memref<1x8x128xf32, #tpu.memory_space<vmem>>, %arg6: memref<1x1x2x128xf32, #tpu.memory_space<vmem>>) attributes {dimension_semantics = [#tpu.dimension_semantics<parallel>, #tpu.dimension_semantics<parallel>], iteration_bounds = array<i64: 2, 2>, scalar_prefetch = 0 : i64, scratch_operands = 0 : i64, tpu.core_type = #tpu.core_type<tc>, window_params = [{transform_indices = @transform_0, window_bounds = array<i64: 1, 1, 10, 72>}, {pipeline_mode = #tpu.pipeline_mode<synchronous>, transform_indices = @transform_1, window_bounds = array<i64: 216, 128>}, {pipeline_mode = #tpu.pipeline_mode<synchronous>, transform_indices = @transform_2, window_bounds = array<i64: 1, 128>}, {transform_indices = @transform_3, window_bounds = array<i64: 1, 8, 128>}, {transform_indices = @transform_4, window_bounds = array<i64: 1, 1, 2, 128>}]} {
    %c0 = arith.constant 0 : index
    %c0_0 = arith.constant 0 : index
    %c0_1 = arith.constant 0 : index
    %c0_2 = arith.constant 0 : index
    %0 = vector.load %arg2[%c0, %c0_0, %c0_1, %c0_2] : memref<1x1x10x72xf32, #tpu.memory_space<vmem>>, vector<1x1x10x72xf32>
    %1 = vector.shape_cast %0 : vector<1x1x10x72xf32> to vector<10x72xf32>
    %2 = vector.extract_strided_slice %1 {offsets = [0, 0], sizes = [8, 72], strides = [1, 1]} : vector<10x72xf32> to vector<8x72xf32>
    %3 = vector.extract_strided_slice %1 {offsets = [1, 0], sizes = [8, 72], strides = [1, 1]} : vector<10x72xf32> to vector<8x72xf32>
    %4 = vector.extract_strided_slice %1 {offsets = [2, 0], sizes = [8, 72], strides = [1, 1]} : vector<10x72xf32> to vector<8x72xf32>
    %5 = tpu.concatenate %2, %3, %4 in 1 : vector<8x72xf32>, vector<8x72xf32>, vector<8x72xf32> -> vector<8x216xf32>
    %c0_3 = arith.constant 0 : index
    %c0_4 = arith.constant 0 : index
    %6 = vector.load %arg3[%c0_3, %c0_4] : memref<216x128xf32, #tpu.memory_space<vmem>>, vector<216x128xf32>
    %cst = arith.constant dense<0.000000e+00> : vector<8x128xf32>
    %7 = tpu.matmul %5, %6, %cst {dimension_numbers = #tpu.dot_dimension_numbers<[1], [0], [0], [1], [0, 0, 1, 1], [], []>} : vector<8x216xf32>, vector<216x128xf32>, vector<8x128xf32> -> vector<8x128xf32>
    %c0_5 = arith.constant 0 : index
    %c0_6 = arith.constant 0 : index
    %8 = vector.load %arg4[%c0_5, %c0_6] : memref<1x128xf32, #tpu.memory_space<vmem>>, vector<1x128xf32>
    %9 = vector.broadcast %8 : vector<1x128xf32> to vector<8x128xf32>
    %10 = arith.addf %7, %9 : vector<8x128xf32>
    %c0_7 = arith.constant 0 : index
    %c0_8 = arith.constant 0 : index
    %c0_9 = arith.constant 0 : index
    %11 = vector.load %arg5[%c0_7, %c0_8, %c0_9] : memref<1x8x128xf32, #tpu.memory_space<vmem>>, vector<1x8x128xf32>
    %12 = vector.shape_cast %11 : vector<1x8x128xf32> to vector<8x128xf32>
    %13 = vector.shape_cast %10 : vector<8x128xf32> to vector<1x8x128xf32>
    tpu.vector_store %arg5[%c0_7, %c0_8, %c0_9], %13 {strides = array<i32>} : memref<1x8x128xf32, #tpu.memory_space<vmem>>, vector<1x8x128xf32>,
    %cst_10 = arith.constant dense<0.000000e+00> : vector<128xf32>
    %14 = vector.multi_reduction <add>, %10, %cst_10 [0] : vector<8x128xf32> to vector<128xf32>
    %15 = vector.shape_cast %14 : vector<128xf32> to vector<1x128xf32>
    %16 = arith.mulf %10, %10 : vector<8x128xf32>
    %cst_11 = arith.constant dense<0.000000e+00> : vector<128xf32>
    %17 = vector.multi_reduction <add>, %16, %cst_11 [0] : vector<8x128xf32> to vector<128xf32>
    %18 = vector.shape_cast %17 : vector<128xf32> to vector<1x128xf32>
    %19 = tpu.concatenate %15, %18 in 0 : vector<1x128xf32>, vector<1x128xf32> -> vector<2x128xf32>
    %c0_12 = arith.constant 0 : index
    %c0_13 = arith.constant 0 : index
    %c0_14 = arith.constant 0 : index
    %c0_15 = arith.constant 0 : index
    %20 = vector.load %arg6[%c0_12, %c0_13, %c0_14, %c0_15] : memref<1x1x2x128xf32, #tpu.memory_space<vmem>>, vector<1x1x2x128xf32>
    %21 = vector.shape_cast %20 : vector<1x1x2x128xf32> to vector<2x128xf32>
    %22 = vector.shape_cast %19 : vector<2x128xf32> to vector<1x1x2x128xf32>
    tpu.vector_store %arg6[%c0_12, %c0_13, %c0_14, %c0_15], %22 {strides = array<i32>} : memref<1x1x2x128xf32, #tpu.memory_space<vmem>>, vector<1x1x2x128xf32>,
    return
  }
  func.func @transform_0(%arg0: i32, %arg1: i32) -> (i32, i32, i32, i32) {
    %c0_i32 = arith.constant 0 : i32
    %c0_i32_0 = arith.constant 0 : i32
    %c0_i32_1 = arith.constant 0 : i32
    return %arg0, %arg1, %c0_i32, %c0_i32_0 : i32, i32, i32, i32
  }
  func.func @transform_1(%arg0: i32, %arg1: i32) -> (i32, i32) {
    %c0_i32 = arith.constant 0 : i32
    %c0_i32_0 = arith.constant 0 : i32
    %c0_i32_1 = arith.constant 0 : i32
    return %c0_i32, %c0_i32_0 : i32, i32
  }
  func.func @transform_2(%arg0: i32, %arg1: i32) -> (i32, i32) {
    %c0_i32 = arith.constant 0 : i32
    %c0_i32_0 = arith.constant 0 : i32
    %c0_i32_1 = arith.constant 0 : i32
    return %c0_i32, %c0_i32_0 : i32, i32
  }
  func.func @transform_3(%arg0: i32, %arg1: i32) -> (i32, i32, i32) {
    %c0_i32 = arith.constant 0 : i32
    %c0_i32_0 = arith.constant 0 : i32
    return %arg0, %arg1, %c0_i32 : i32, i32, i32
  }
  func.func @transform_4(%arg0: i32, %arg1: i32) -> (i32, i32, i32, i32) {
    %c0_i32 = arith.constant 0 : i32
    %c0_i32_0 = arith.constant 0 : i32
    %c0_i32_1 = arith.constant 0 : i32
    return %arg0, %arg1, %c0_i32, %c0_i32_0 : i32, i32, i32, i32
  }
}

module attributes {stable_mosaic.version = 11 : i64} {
  func.func @_bn_lrelu_kernel(%arg0: i32, %arg1: i32, %arg2: memref<1x8x128xf32, #tpu.memory_space<vmem>>, %arg3: memref<1x128xf32, #tpu.memory_space<vmem>>, %arg4: memref<1x128xf32, #tpu.memory_space<vmem>>, %arg5: memref<1x8x128xf32, #tpu.memory_space<vmem>>) attributes {dimension_semantics = [#tpu.dimension_semantics<parallel>, #tpu.dimension_semantics<parallel>], iteration_bounds = array<i64: 2, 2>, scalar_prefetch = 0 : i64, scratch_operands = 0 : i64, tpu.core_type = #tpu.core_type<tc>, window_params = [{transform_indices = @transform_0, window_bounds = array<i64: 1, 8, 128>}, {pipeline_mode = #tpu.pipeline_mode<synchronous>, transform_indices = @transform_1, window_bounds = array<i64: 1, 128>}, {pipeline_mode = #tpu.pipeline_mode<synchronous>, transform_indices = @transform_2, window_bounds = array<i64: 1, 128>}, {transform_indices = @transform_3, window_bounds = array<i64: 1, 8, 128>}]} {
    %c0 = arith.constant 0 : index
    %c0_0 = arith.constant 0 : index
    %c0_1 = arith.constant 0 : index
    %0 = vector.load %arg2[%c0, %c0_0, %c0_1] : memref<1x8x128xf32, #tpu.memory_space<vmem>>, vector<1x8x128xf32>
    %1 = vector.shape_cast %0 : vector<1x8x128xf32> to vector<8x128xf32>
    %c0_2 = arith.constant 0 : index
    %c0_3 = arith.constant 0 : index
    %2 = vector.load %arg3[%c0_2, %c0_3] : memref<1x128xf32, #tpu.memory_space<vmem>>, vector<1x128xf32>
    %3 = vector.broadcast %2 : vector<1x128xf32> to vector<8x128xf32>
    %4 = arith.mulf %1, %3 : vector<8x128xf32>
    %c0_4 = arith.constant 0 : index
    %c0_5 = arith.constant 0 : index
    %5 = vector.load %arg4[%c0_4, %c0_5] : memref<1x128xf32, #tpu.memory_space<vmem>>, vector<1x128xf32>
    %6 = vector.broadcast %5 : vector<1x128xf32> to vector<8x128xf32>
    %7 = arith.addf %4, %6 : vector<8x128xf32>
    %cst = arith.constant 0.000000e+00 : f32
    %8 = vector.broadcast %cst : f32 to vector<8x128xf32>
    %9 = arith.cmpf oge, %7, %8 : vector<8x128xf32>
    %cst_6 = arith.constant 0.00999999977 : f32
    %10 = vector.broadcast %cst_6 : f32 to vector<8x128xf32>
    %11 = arith.mulf %10, %7 : vector<8x128xf32>
    %12 = arith.select %9, %7, %11 : vector<8x128xi1>, vector<8x128xf32>
    %c0_7 = arith.constant 0 : index
    %c0_8 = arith.constant 0 : index
    %c0_9 = arith.constant 0 : index
    %13 = vector.load %arg5[%c0_7, %c0_8, %c0_9] : memref<1x8x128xf32, #tpu.memory_space<vmem>>, vector<1x8x128xf32>
    %14 = vector.shape_cast %13 : vector<1x8x128xf32> to vector<8x128xf32>
    %15 = vector.shape_cast %12 : vector<8x128xf32> to vector<1x8x128xf32>
    tpu.vector_store %arg5[%c0_7, %c0_8, %c0_9], %15 {strides = array<i32>} : memref<1x8x128xf32, #tpu.memory_space<vmem>>, vector<1x8x128xf32>,
    return
  }
  func.func @transform_0(%arg0: i32, %arg1: i32) -> (i32, i32, i32) {
    %c0_i32 = arith.constant 0 : i32
    %c0_i32_0 = arith.constant 0 : i32
    return %arg0, %arg1, %c0_i32 : i32, i32, i32
  }
  func.func @transform_1(%arg0: i32, %arg1: i32) -> (i32, i32) {
    %c0_i32 = arith.constant 0 : i32
    %c0_i32_0 = arith.constant 0 : i32
    %c0_i32_1 = arith.constant 0 : i32
    return %c0_i32, %c0_i32_0 : i32, i32
  }
  func.func @transform_2(%arg0: i32, %arg1: i32) -> (i32, i32) {
    %c0_i32 = arith.constant 0 : i32
    %c0_i32_0 = arith.constant 0 : i32
    %c0_i32_1 = arith.constant 0 : i32
    return %c0_i32, %c0_i32_0 : i32, i32
  }
  func.func @transform_3(%arg0: i32, %arg1: i32) -> (i32, i32, i32) {
    %c0_i32 = arith.constant 0 : i32
    %c0_i32_0 = arith.constant 0 : i32
    return %arg0, %arg1, %c0_i32 : i32, i32, i32
  }
}

</mosaic_0001>

<bundles_post_ra>
// kernel: tile.18
= control target key start
LH: loop header
LB: loop body
LE: loop exit
PB: predicated region body
PF: predicated region fallthrough
CT: control target
= control target key end

     0   :  { %s28_s0 = inlined_call_operand.vmem [shape: f32[8], index: 0, kind: input, shape index: {}]   ;;  %s29_s1 = inlined_call_operand.vmem [shape: f32[16,8], index: 1, kind: output, shape index: {}]  }
   0x1   :  { %v4_v0 = vld [vmem:[%s28_s0] ss:$0 sm:$0xff] }
   0x2   :  { %5 = vst [vmem:[%s29_s1] sm:$0xff] %v4_v0  ;;  %8 = vst [vmem:[%s29_s1 + $0x8] sm:$0xff] %v4_v0 }

// kernel: tile.19
= control target key start
LH: loop header
LB: loop body
LE: loop exit
PB: predicated region body
PF: predicated region fallthrough
CT: control target
= control target key end

     0   :  { %s131_s10 = smov 120   ;;  %s132_s11 = smov 104   ;;  %vm3_vm0 = vcmask 64512   ;;  %vm9_vm1 = vcmask 1048512   ;;  %vm15_vm2 = vcmask 982912   ;;  %vm21_vm3 = vcmask 917312   ;;  %s207_s0 = inlined_call_operand.vmem [shape: f32[16,8], index: 0, kind: input, shape index: {}]   ;;  %s208_s1 = inlined_call_operand.vmem [shape: f32[1,128], index: 1, kind: output, shape index: {}]  }
   0x1   :  { %v101_v0 = vld [vmem:[%s207_s0 + $0xf] sm:$0x1]   ;;  %v103_v1 = vld [vmem:[%s207_s0 + $0xd] sm:$0x1]   ;;  %v102_v2 = vld [vmem:[%s207_s0 + $0xe] sm:$0x1]  }
   0x2   :  { %7 = vrot.lane.b32.xlu0 %v101_v0, %s131_s10  ;;  %19 = vrot.lane.b32.xlu1 %v103_v1, %s132_s11  ;;  %v104_v3 = vld [vmem:[%s207_s0 + $0xc] sm:$0x1]   ;;  %s133_s16 = smov 112   ;;  %s134_s17 = smov 96   ;;  %v105_v4 = vld [vmem:[%s207_s0 + $0xb] sm:$0x1]  }
   0x3   :  { %v106_v5 = vld [vmem:[%s207_s0 + $0xa] sm:$0x1]   ;;  %v2_v6 = vld [vmem:[%s207_s0] sm:$0x1]   ;;  %s135_s24 = smov 88   ;;  %s136_s25 = smov 80  }
   0x4   :  { %4 = vst.msk [vmem:[#allocation0] sm:$0x1] %vm3_vm0, %v2_v6   ;;  %v107_v7 = vld [vmem:[%s207_s0 + $0x9] sm:$0x1]   ;;  %v108_v8 = vld [vmem:[%s207_s0 + $0x8] sm:$0x1]  }
   0x5   :  { %s137_s30 = smov 72   ;;  %s138_s2 = smov 64   ;;  %v109_v9 = vld [vmem:[%s207_s0 + $0x7] sm:$0x1]   ;;  %v110_v10 = vld [vmem:[%s207_s0 + $0x6] sm:$0x1]  }
   0x6   :  { %13 = vrot.lane.b32.xlu0 %v102_v2, %s133_s16  ;;  %25 = vrot.lane.b32.xlu1 %v104_v3, %s134_s17  ;;  %s139_s7 = smov 56   ;;  %s140_s8 = smov 48   ;;  %v111_v11 = vld [vmem:[%s207_s0 + $0x5] sm:$0x1]   ;;  %v112_v12 = vld [vmem:[%s207_s0 + $0x4] sm:$0x1]  }
   0x7   :  { %s141_s13 = smov 40   ;;  %s142_s14 = smov 32   ;;  %v113_v13 = vld [vmem:[%s207_s0 + $0x3] sm:$0x1]   ;;  %v114_v14 = vld [vmem:[%s207_s0 + $0x2] sm:$0x1]  }
   0x8   :  { %s143_s19 = smov 24   ;;  %s144_s20 = smov 16   ;;  %v115_v15 = vld [vmem:[%s207_s0 + $0x1] sm:$0x1]   ;;  %vm27_vm4 = vcmask 851712   ;;  %vm33_vm5 = vcmask 786112  }
   0x9   :  { %s145_s0 = smov 8   ;;  %vm39_vm6 = vcmask 720512   ;;  %vm45_vm7 = vcmask 654912   ;;  %vm51_vm8 = vcmask 589312   ;;  %vm57_vm9 = vcmask 523712  }
   0xa   :  { %31 = vrot.lane.b32.xlu0 %v105_v4, %s135_s24  ;;  %37 = vrot.lane.b32.xlu1 %v106_v5, %s136_s25  ;;  %vm63_vm10 = vcmask 458112   ;;  %vm69_vm11 = vcmask 392512   ;;  %vm75_vm12 = vcmask 326912   ;;  %vm81_vm13 = vcmask 261312  }
   0xb   :  { %vm87_vm14 = vcmask 195712   ;;  %vm93_vm15 = vcmask 130112  }
   0xe   :  { %43 = vrot.lane.b32.xlu0 %v107_v7, %s137_s30  ;;  %49 = vrot.lane.b32.xlu1 %v108_v8, %s138_s2 }
  0x12   :  { %55 = vrot.lane.b32.xlu0 %v109_v9, %s139_s7  ;;  %61 = vrot.lane.b32.xlu1 %v110_v10, %s140_s8 }
  0x16   :  { %67 = vrot.lane.b32.xlu0 %v111_v11, %s141_s13  ;;  %73 = vrot.lane.b32.xlu1 %v112_v12, %s142_s14 }
  0x1a   :  { %79 = vrot.lane.b32.xlu0 %v113_v13, %s143_s19  ;;  %85 = vrot.lane.b32.xlu1 %v114_v14, %s144_s20 }
  0x1e   :  { %91 = vrot.lane.b32.xlu0 %v115_v15, %s145_s0 }
  0x74   :  { %v8_v16 = vpop.permute.xlu0 %7   ;;  %v20_v17 = vpop.permute.xlu1 %19  }
  0x75   :  { %10 = vst.msk [vmem:[#allocation0] sm:$0x1] %vm9_vm1, %v8_v16  }
  0x78   :  { %v14_v18 = vpop.permute.xlu0 %13   ;;  %v26_v19 = vpop.permute.xlu1 %25  }
  0x79   :  { %16 = vst.msk [vmem:[#allocation0] sm:$0x1] %vm15_vm2, %v14_v18  }
  0x7a   :  { %22 = vst.msk [vmem:[#allocation0] sm:$0x1] %vm21_vm3, %v20_v17  }
  0x7b   :  { %28 = vst.msk [vmem:[#allocation0] sm:$0x1] %vm27_vm4, %v26_v19  }
  0x7c   :  { %v32_v20 = vpop.permute.xlu0 %31   ;;  %v38_v21 = vpop.permute.xlu1 %37  }
  0x7d   :  { %34 = vst.msk [vmem:[#allocation0] sm:$0x1] %vm33_vm5, %v32_v20  }
  0x7e   :  { %40 = vst.msk [vmem:[#allocation0] sm:$0x1] %vm39_vm6, %v38_v21  }
  0x80   :  { %v44_v22 = vpop.permute.xlu0 %43   ;;  %v50_v23 = vpop.permute.xlu1 %49  }
  0x81   :  { %46 = vst.msk [vmem:[#allocation0] sm:$0x1] %vm45_vm7, %v44_v22  }
  0x82   :  { %52 = vst.msk [vmem:[#allocation0] sm:$0x1] %vm51_vm8, %v50_v23  }
  0x84   :  { %v56_v24 = vpop.permute.xlu0 %55   ;;  %v62_v25 = vpop.permute.xlu1 %61  }
  0x85   :  { %58 = vst.msk [vmem:[#allocation0] sm:$0x1] %vm57_vm9, %v56_v24  }
  0x86   :  { %64 = vst.msk [vmem:[#allocation0] sm:$0x1] %vm63_vm10, %v62_v25  }
  0x88   :  { %v68_v26 = vpop.permute.xlu0 %67   ;;  %v74_v27 = vpop.permute.xlu1 %73  }
  0x89   :  { %70 = vst.msk [vmem:[#allocation0] sm:$0x1] %vm69_vm11, %v68_v26  }
  0x8a   :  { %76 = vst.msk [vmem:[#allocation0] sm:$0x1] %vm75_vm12, %v74_v27  }
  0x8c   :  { %v80_v28 = vpop.permute.xlu0 %79   ;;  %v86_v29 = vpop.permute.xlu1 %85  }
  0x8d   :  { %82 = vst.msk [vmem:[#allocation0] sm:$0x1] %vm81_vm13, %v80_v28  }
  0x8e   :  { %88 = vst.msk [vmem:[#allocation0] sm:$0x1] %vm87_vm14, %v86_v29  }
  0x90   :  { %v92_v30 = vpop.permute.xlu0 %91  }
  0x91   :  { %94 = vst.msk [vmem:[#allocation0] sm:$0x1] %vm93_vm15, %v92_v30  }
  0x98   :  { %v98_v31 = vld [vmem:[#allocation0] sm:$0x1] }
  0x99   :  { %100 = vst [vmem:[%s208_s1] sm:$0x1] %v98_v31 }

// kernel: conv_bn_lrelu.2
= control target key start
LH: loop header
LB: loop body
LE: loop exit
PB: predicated region body
PF: predicated region fallthrough
CT: control target
= control target key end

     0   :  { %s704_s15 = smov 0   ;;  %s706_s16 = smov 0   ;;  %s864_s0 = inlined_call_operand.vmem [shape: f32[2,2,10,72], index: 0, kind: input, shape index: {}]   ;;  %s865_s1 = inlined_call_operand.vmem [shape: f32[216,128], index: 1, kind: input, shape index: {}]   ;;  %s866_s2 = inlined_call_operand.vmem [shape: f32[1,128], index: 2, kind: input, shape index: {}]   ;;  %s867_s3 = inlined_call_operand.vmem [shape: f32[2,16,128], index: 3, kind: output, shape index: {0}]   ;;  %s868_s4 = inlined_call_operand.vmem [shape: f32[2,2,2,128], index: 4, kind: output, shape index: {1}]  }
   0x1   :  { %s708_s17 = smov 0   ;;  %s710_s18 = smov 0  }
   0x2   :  { %s712_s19 = smov 0  }
   0x3 LB: > { %s24_s20 = sadd.s32 1, %s665_s17  ;;  %s27_s21 = sadd.s32 1, %s669_s18  ;;  %s673_s19 = sphi %s712_s19, %s15_s19   ;;  %s669_s18 = sphi %s710_s18, %s872_s18   ;;  %s665_s17 = sphi %s708_s17, %s871_s17   ;;  %s661_s16 = sphi %s706_s16, %s870_s16   ;;  %s657_s15 = sphi %s704_s15, %s869_s15  }
   0x4   : > { %p25_p0 = scmp.ge.s32.totalorder %s24_s20, 2  ;;  %p540_p1 = scmp.ge.s32.totalorder %s673_s19, 1 }
   0x5   : > { %p187_p2 = scmp.lt.s32.totalorder %s673_s19, 5 }
   0x6   : > { %s874_s20 = smov (%p25_p0, %s24_s20), 0  ;;  %s876_s21 = smov (!%p25_p0, %s27_s21), %s669_s18 }
   0x7   : > { %p188_p3 = pnand %p540_p1, %p187_p2  ;;  %p29_p4 = scmp.ge.s32.totalorder %s876_s21, 2 }
   0x8   : > { %p228_p5 = scmp.lt.s32.totalorder (!%p188_p3), %s661_s16, 1  ;;  %p230_p6 = scmp.lt.s32.totalorder (!%p188_p3), %s657_s15, 1  ;;  %v275_v0 = vld [vmem:[%s865_s1] sm:$0xff] (!%p188_p3)  ;;  %v675_v1 = vmov (!%p188_p3), 0.0|0.0   ;;  %v276_v2 = vld [vmem:[%s865_s1 + $0x8] sm:$0xff] (!%p188_p3)  ;;  %v277_v3 = vld [vmem:[%s865_s1 + $0x10] sm:$0xff] (!%p188_p3) }
   0x9   : > { %s878_s21 = smov (%p29_p4, %s876_s21), 0  ;;  %191 = sbr.rel (%p188_p3) target bundleno = 376 (0x178), region = 32 }
   0xa   : > { %552 = vmatprep.subr.bf16.mxu0 (!%p188_p3), %v675_v1  ;;  %v278_v4 = vld [vmem:[%s865_s1 + $0x18] sm:$0xff] (!%p188_p3)  ;;  %v553_v5 = vpack.c.bf16 (!%p188_p3), %v276_v2, %v275_v0  ;;  %v279_v7 = vld [vmem:[%s865_s1 + $0x20] sm:$0xff] (!%p188_p3)  ;;  %v280_v8 = vld [vmem:[%s865_s1 + $0x28] sm:$0xff] (!%p188_p3)  ;;  %vm257_vm0 = vcmask (!%p188_p3), 1046528   ;;  %vm264_vm1 = vcmask (!%p188_p3), 1045504   ;;  %v678_v48 = vmov (!%p188_p3), 0.0  }
   0xb   : > { %v556_v6 = vpack.c.bf16 (!%p188_p3), %v278_v4, %v277_v3  ;;  %v559_v9 = vpack.c.bf16 (!%p188_p3), %v280_v8, %v279_v7  ;;  %v281_v10 = vld [vmem:[%s865_s1 + $0x30] sm:$0xff] (!%p188_p3)  ;;  %v282_v13 = vld [vmem:[%s865_s1 + $0x38] sm:$0xff] (!%p188_p3)  ;;  %v283_v20 = vld [vmem:[%s865_s1 + $0x40] sm:$0xff] (!%p188_p3)  ;;  %vm273_vm2 = vcmask (!%p188_p3), 130048   ;;  %vm309_vm3 = vcmask (!%p188_p3), 719872  }
   0xc   : > { %554 = vmatpush1.bf16.msra.mxu0 (!%p188_p3), %v553_v5  ;;  %v562_v19 = vpack.c.bf16 (!%p188_p3), %v282_v13, %v281_v10  ;;  %v284_v21 = vld [vmem:[%s865_s1 + $0x48] sm:$0xff] (!%p188_p3)  ;;  %v285_v24 = vld [vmem:[%s865_s1 + $0x50] sm:$0xff] (!%p188_p3)  ;;  %v286_v25 = vld [vmem:[%s865_s1 + $0x58] sm:$0xff] (!%p188_p3)  ;;  %vm271_vm4 = vcmask (!%p188_p3), 588800   ;;  %vm397_vm5 = vcmask (!%p188_p3), 1040384  }
   0xd   : > { %555 = vmatprep.subr.bf16.mxu0 (!%p188_p3), %v675_v1  ;;  %v565_v23 = vpack.c.bf16 (!%p188_p3), %v284_v21, %v283_v20  ;;  %v568_v26 = vpack.c.bf16 (!%p188_p3), %v286_v25, %v285_v24  ;;  %v287_v27 = vld [vmem:[%s865_s1 + $0x60] sm:$0xff] (!%p188_p3)  ;;  %v288_v28 = vld [vmem:[%s865_s1 + $0x68] sm:$0xff] (!%p188_p3)  ;;  %v289_v30 = vld [vmem:[%s865_s1 + $0x70] sm:$0xff] (!%p188_p3) }
   0xe   : > { %v571_v29 = vpack.c.bf16 (!%p188_p3), %v288_v28, %v287_v27  ;;  %v290_v31 = vld [vmem:[%s865_s1 + $0x78] sm:$0xff] (!%p188_p3)  ;;  %v291_v33 = vld [vmem:[%s865_s1 + $0x80] sm:$0xff] (!%p188_p3)  ;;  %v292_v34 = vld [vmem:[%s865_s1 + $0x88] sm:$0xff] (!%p188_p3) }
   0xf   : > { %v574_v32 = vpack.c.bf16 (!%p188_p3), %v290_v31, %v289_v30  ;;  %v577_v35 = vpack.c.bf16 (!%p188_p3), %v292_v34, %v291_v33  ;;  %v293_v36 = vld [vmem:[%s865_s1 + $0x90] sm:$0xff] (!%p188_p3)  ;;  %v294_v37 = vld [vmem:[%s865_s1 + $0x98] sm:$0xff] (!%p188_p3)  ;;  %v295_v39 = vld [vmem:[%s865_s1 + $0xa0] sm:$0xff] (!%p188_p3) }
  0x10   : > { %s880_s16 = smov (!%p228_p5, %s661_s16), 1  ;;  %s882_s15 = smov (!%p230_p6, %s657_s15), 1  ;;  %557 = vmatpush1.bf16.msra.mxu0 %v556_v6  ;;  %v580_v38 = vpack.c.bf16 %v294_v37, %v293_v36  ;;  %v296_v40 = vld [vmem:[%s865_s1 + $0xa8] sm:$0xff]  ;;  %v297_v42 = vld [vmem:[%s865_s1 + $0xb0] sm:$0xff]  ;;  %v298_v43 = vld [vmem:[%s865_s1 + $0xb8] sm:$0xff] }
  0x11   : > { %s542_s30 = sshll.u32 %s880_s16, 2  ;;  %s541_s5 = sshll.u32 %s882_s15, 1  ;;  %558 = vmatprep.subr.bf16.mxu0 %v675_v1  ;;  %v583_v41 = vpack.c.bf16 %v296_v40, %v295_v39  ;;  %v586_v44 = vpack.c.bf16 %v298_v43, %v297_v42  ;;  %v299_v45 = vld [vmem:[%s865_s1 + $0xc0] sm:$0xff]  ;;  %v300_v46 = vld [vmem:[%s865_s1 + $0xc8] sm:$0xff]  ;;  %v301_v49 = vld [vmem:[%s865_s1 + $0xd0] sm:$0xff] }
  0x12   : > { %s234_s10 = sadd.s32 %s542_s30, %s541_s5  ;;  %s544_s11 = sshll.u32 %s880_s16, 1  ;;  %v589_v47 = vpack.c.bf16 %v300_v46, %v299_v45  ;;  %v548_v54 = vld [vmem:[%s866_s2] ss:$0 sm:$0xff] }
  0x13   : > { %s543_s12 = sshll.u32 %s234_s10, 3  ;;  %s754_s13 = sadd.s32 %s544_s11, %s882_s15 }
  0x14   : > { %s236_s23 = scalar_lea.vmem %s864_s0, %s543_s12  ;;  %560 = vmatpush1.bf16.msra.mxu0 %v559_v9  ;;  %s676_s15 = smov 72  }
  0x15   : > { %v762_v11 = vld [vmem:[%s236_s23] sm:$0xff]  ;;  %v254_v12 = vld [vmem:[%s236_s23 + $0x8] sm:$0x3]  ;;  %561 = vmatprep.subr.bf16.mxu0 %v675_v1  ;;  %s677_s5 = smov 16   ;;  %s547_s6 = sshll.u32 %s754_s13, 1 }
  0x16   : > { %v258_v14 = vrot.slane %v762_v11, 1  ;;  %v259_v15 = vrot.slane %v254_v12, 1  ;;  %v265_v16 = vrot.slane %v762_v11, 2  ;;  %v266_v17 = vrot.slane %v254_v12, 2  ;;  %s252_s9 = scalar_lea.vmem %s868_s4, %s547_s6 }
  0x18   : > { %v260_v18 = vsel %vm257_vm0, %v258_v14, %v259_v15  ;;  %v267_v22 = vsel %vm264_vm1, %v265_v16, %v266_v17  ;;  %563 = vmatpush1.bf16.msra.mxu0 %v562_v19 }
  0x19   : > { %261 = vrot.lane.b32.xlu0 %v260_v18, %s676_s15  ;;  %564 = vmatprep.subr.bf16.mxu0 %v675_v1  ;;  %s545_s15 = sshll.u32 %s754_s13, 3 }
  0x1c   : > { %566 = vmatpush1.bf16.msra.mxu0 %v565_v23 }
  0x1d   : > { %268 = vrot.lane.b32.xlu0 %v267_v22, %s677_s5  ;;  %567 = vmatprep.subr.bf16.mxu0 %v675_v1  ;;  %s244_s5 = scalar_lea.vmem %s867_s3, %s545_s15 }
  0x20   : > { %569 = vmatpush1.bf16.msra.mxu0 %v568_v26 }
  0x21   : > { %570 = vmatprep.subr.bf16.mxu0 %v675_v1 }
  0x24   : > { %572 = vmatpush1.bf16.msra.mxu0 %v571_v29 }
  0x25   : > { %573 = vmatprep.subr.bf16.mxu0 %v675_v1 }
  0x28   : > { %575 = vmatpush1.bf16.msra.mxu0 %v574_v32 }
  0x29   : > { %576 = vmatprep.subr.bf16.mxu0 %v675_v1 }
  0x2c   : > { %578 = vmatpush1.bf16.msra.mxu0 %v577_v35 }
  0x2d   : > { %579 = vmatprep.subr.bf16.mxu0 %v675_v1 }
  0x30   : > { %581 = vmatpush1.bf16.msra.mxu0 %v580_v38 }
  0x31   : > { %582 = vmatprep.subr.bf16.mxu0 %v675_v1 }
  0x34   : > { %584 = vmatpush1.bf16.msra.mxu0 %v583_v41 }
  0x35   : > { %585 = vmatprep.subr.bf16.mxu0 %v675_v1 }
  0x38   : > { %587 = vmatpush1.bf16.msra.mxu0 %v586_v44 }
  0x39   : > { %588 = vmatprep.subr.bf16.mxu0 %v675_v1 }
  0x3c   : > { %590 = vmatpush1.bf16.msra.mxu0 %v589_v47 }
  0x3d   : > { %365 = vmatprep.subr.mxu0 %v678_v48 }
  0x40   : > { %366 = vmatpush1.msra.mxu0 %v301_v49 }
  0x8b   : > { %v262_v50 = vpop.permute.xlu0 %261 }
  0x8c   : > { %v272_v53 = vsel %vm271_vm4, %v762_v11, %v262_v50 }
  0x8f   : > { %v269_v51 = vpop.permute.xlu0 %268 }
  0x90   : > { %v274_v52 = vsel %vm273_vm2, %v262_v50, %v269_v51 }
  0x91   : > { %549 = vmatprep.mubr.msk.f32.mxu0 %vm309_vm3, %v274_v52 }
  0x92   : > { %378 = vmatmul.mubr.f32.vlgmr.msra.gmra.mrb[0].mxu0 %v272_v53 }
 0x165   : > { %v379_v55 = vpop.f32.mrb[0].mxu0 }
 0x166   : > { %v380_v56 = vadd.f32 %v548_v54, %v379_v55  ;;  %v381_v57 = vpop.f32.mrb[1].mxu0 }
 0x168   : > { %383 = vst [vmem:[%s244_s5] sm:$0xff] %v380_v56  ;;  %v384_v58 = vrot.slane %v380_v56, 4  ;;  %v390_v59 = vmul.f32 %v380_v56, %v380_v56 }
 0x16a   : > { %v385_v60 = vadd.f32 %v384_v58, %v380_v56  ;;  %v391_v61 = vrot.slane %v390_v59, 4 }
 0x16c   : > { %v386_v62 = vrot.slane %v385_v60, 2  ;;  %v392_v63 = vadd.f32 %v391_v61, %v390_v59 }
 0x16e   : > { %v387_v0 = vadd.f32 %v386_v62, %v385_v60  ;;  %v393_v1 = vrot.slane %v392_v63, 2 }
 0x170   : > { %v388_v2 = vrot.slane %v387_v0, 1  ;;  %v394_v3 = vadd.f32 %v393_v1, %v392_v63 }
 0x172   : > { %v395_v4 = vrot.slane %v394_v3, 1  ;;  %v389_v5 = vadd.f32 %v388_v2, %v387_v0 }
 0x174   : > { %v396_v6 = vadd.f32 %v395_v4, %v394_v3 }
 0x176   : > { %v398_v7 = vsel %vm397_vm5, %v389_v5, %v396_v6 }
 0x177   : > { %399 = vst [vmem:[%s252_s9] sm:$0x3] %v398_v7 }
 0x178 PF: > { %s15_s19 = sadd.s32 1, %s673_s19   ;;  %s869_s15 = smov %s665_s17 }
 0x179   : > { %p12_p7 = scmp.ge.s32.totalorder %s15_s19, 6   ;;  %s870_s16 = smov %s669_s18 }
 0x17a   : > { %s871_s17 = smov %s874_s20  ;;  %s872_s18 = smov %s878_s21 }
 0x17b   :  { %14 = sbr.rel (!%p12_p7) target bundleno = 3 (0x3), region = 74 }

// kernel: conv_bn_lrelu.3
= control target key start
LH: loop header
LB: loop body
LE: loop exit
PB: predicated region body
PF: predicated region fallthrough
CT: control target
= control target key end

     0   :  { %s422_s12 = smov 0   ;;  %s424_s13 = smov 0   ;;  %s473_s0 = inlined_call_operand.vmem [shape: f32[2,16,128], index: 0, kind: input, shape index: {}]   ;;  %s474_s1 = inlined_call_operand.vmem [shape: f32[1,128], index: 1, kind: input, shape index: {}]   ;;  %s475_s2 = inlined_call_operand.vmem [shape: f32[1,128], index: 2, kind: input, shape index: {}]   ;;  %s476_s3 = inlined_call_operand.vmem [shape: f32[2,16,128], index: 3, kind: output, shape index: {}]  }
   0x1   :  { %s426_s14 = smov 0   ;;  %s428_s15 = smov 0  }
   0x2   :  { %s430_s16 = smov 0  }
   0x3 LB: > { %s22_s17 = sadd.s32 1, %s392_s14  ;;  %s25_s18 = sadd.s32 1, %s396_s15  ;;  %s400_s16 = sphi %s430_s16, %s13_s16   ;;  %s396_s15 = sphi %s428_s15, %s480_s15   ;;  %s392_s14 = sphi %s426_s14, %s479_s14   ;;  %s388_s13 = sphi %s424_s13, %s478_s13   ;;  %s384_s12 = sphi %s422_s12, %s477_s12  }
   0x4   : > { %p23_p0 = scmp.ge.s32.totalorder %s22_s17, 2  ;;  %p313_p1 = scmp.ge.s32.totalorder %s400_s16, 1 }
   0x5   : > { %p156_p2 = scmp.lt.s32.totalorder %s400_s16, 5 }
   0x6   : > { %s482_s17 = smov (%p23_p0, %s22_s17), 0  ;;  %s484_s18 = smov (!%p23_p0, %s25_s18), %s396_s15 }
   0x7   : > { %p157_p3 = pnand %p313_p1, %p156_p2  ;;  %p27_p4 = scmp.ge.s32.totalorder %s484_s18, 2 }
   0x8   : > { %p186_p5 = scmp.lt.s32.totalorder (!%p157_p3), %s388_s13, 1  ;;  %p188_p6 = scmp.lt.s32.totalorder (!%p157_p3), %s384_s12, 1  ;;  %v318_v0 = vld [vmem:[%s474_s1] ss:$0 sm:$0xff] (!%p157_p3) }
   0x9   : > { %s486_s18 = smov (%p27_p4, %s484_s18), 0  ;;  %160 = sbr.rel (%p157_p3) target bundleno = 30 (0x1e), region = 32 }
   0xa   : > { %v319_v2 = vld [vmem:[%s475_s2] ss:$0 sm:$0xff] (!%p157_p3) }
  0x10   : > { %s488_s13 = smov (!%p186_p5, %s388_s13), 1  ;;  %s490_s12 = smov (!%p188_p6, %s384_s12), 1 }
  0x11   : > { %s314_s19 = sshll.u32 %s488_s13, 1 }
  0x12   : > { %s191_s20 = sadd.s32 %s314_s19, %s490_s12 }
  0x13   : > { %s315_s21 = sshll.u32 %s191_s20, 3 }
  0x14   : > { %s193_s26 = scalar_lea.vmem %s473_s0, %s315_s21  ;;  %s201_s4 = scalar_lea.vmem %s476_s3, %s315_s21 }
  0x15   : > { %v202_v1 = vld [vmem:[%s193_s26] sm:$0xff] }
  0x16   : > { %v210_v3 = vmul.f32 %v318_v0, %v202_v1 }
  0x18   : > { %v218_v4 = vadd.f32 %v319_v2, %v210_v3 }
  0x1a   : > { %vm219_vm0 = vcmp.ge.f32.partialorder %v218_v4, 0.0  ;;  %v220_v5 = vmul.f32 0.01, %v218_v4 }
  0x1c   : > { %v221_v6 = vsel %vm219_vm0, %v218_v4, %v220_v5 }
  0x1d   : > { %222 = vst [vmem:[%s201_s4] sm:$0xff] %v221_v6 }
  0x1e PF: > { %s13_s16 = sadd.s32 1, %s400_s16   ;;  %s477_s12 = smov %s392_s14 }
  0x1f   : > { %p10_p7 = scmp.ge.s32.totalorder %s13_s16, 6   ;;  %s478_s13 = smov %s396_s15 }
  0x20   : > { %s479_s14 = smov %s482_s17  ;;  %s480_s15 = smov %s486_s18 }
  0x21   :  { %12 = sbr.rel (!%p10_p7) target bundleno = 3 (0x3), region = 62 }

</bundles_post_ra>
